<compile_context>
chip_gen: v5e
topology: v5e:2x2
jax: 0.10.0
libtpu: 0.0.40
codegen_flags: <defaults>
</compile_context>

<pallas_src>
import math
from functools import partial

import jax
import jax.numpy as jnp
import numpy as np
from jax import lax
from jax.experimental import pallas as pl
from jax.experimental.pallas import tpu as pltpu


def _sigmoid(v):
    # exp and approx-reciprocal both issue on the EUP slot -> off the VALU critical path.
    return pl.reciprocal(1.0 + jnp.exp(-v), approx=True)


# -----------------------------------------------------------------------------
# Pallas kernel: one batch element per grid step, entire module fused.
# -----------------------------------------------------------------------------
def _conv_module_kernel(len_ref,                        # SMEM scalar prefetch: (B,) int32
                        xa_ref, xb_ref,                 # (1,T4,C) bf16: x rows 4i / 4i+2
                        w1_ref, b1_ref, wdw_ref,
                        bns_ref, bnb_ref, w2_ref, b2_ref,
                        o_ref,
                        ga_pad, gb_pad,                 # VMEM scratch (T4+2*PE, C) f32
                        *, channels, kernel_size, t4):
    C = channels
    K = kernel_size
    T4 = t4
    pad = (K - 1) // 2
    PE = (pad + 1) // 2

    b = pl.program_id(0)
    L = len_ref[b]

    # Valid-row masks rebuilt from the sequence length (no lane-sparse mask DMAs).
    row = lax.broadcasted_iota(jnp.int32, (T4, 1), 0)
    ma = (4 * row) < L          # original rows 4i   (== /4-downsampled output mask)
    mb = (4 * row + 2) < L      # original rows 4i+2

    # masked_fill(~mask, 0) on the rows the stride-2 pointwise conv actually consumes.
    xa = jnp.where(ma, xa_ref[0], 0.0)                   # (T4, C) bf16
    xb = jnp.where(mb, xb_ref[0], 0.0)

    # Pointwise conv 1 (C -> 2C fused in one matmul) + GLU, per polyphase half.
    w1 = w1_ref[...]
    b1 = b1_ref[...]
    y1a = jnp.dot(xa, w1, preferred_element_type=jnp.float32) + b1   # (T4, 2C) f32
    y1b = jnp.dot(xb, w1, preferred_element_type=jnp.float32) + b1
    ga = y1a[:, :C] * _sigmoid(y1a[:, C:])               # g at even rows of the /2 signal
    gb = y1b[:, :C] * _sigmoid(y1b[:, C:])               # g at odd rows of the /2 signal

    # Zero-padded scratch slabs for the depthwise 'SAME' halo.
    if PE > 0:
        z = jnp.zeros((PE, C), jnp.float32)
        ga_pad[pl.ds(0, PE), :] = z
        ga_pad[pl.ds(PE + T4, PE), :] = z
        gb_pad[pl.ds(0, PE), :] = z
        gb_pad[pl.ds(PE + T4, PE), :] = z
    ga_pad[pl.ds(PE, T4), :] = ga
    gb_pad[pl.ds(PE, T4), :] = gb

    # Depthwise conv evaluated only at the rows kept by the second stride-2 conv:
    #   dw[2i] = sum_d w[d+pad] * g[2i+d]; d even -> ga[i+d/2], d odd -> gb[i+(d-1)/2].
    # Polyphase K-tap unroll with unit-stride pl.ds reads (VPU multiply-accumulate).
    w_dw = wdw_ref[...]                                   # (K, C) f32
    acc = jnp.zeros((T4, C), jnp.float32)
    for j in range(K):
        d = j - pad
        if d % 2 == 0:
            src = ga_pad[pl.ds(PE + d // 2, T4), :]
        else:
            src = gb_pad[pl.ds(PE + (d - 1) // 2, T4), :]
        acc = acc + src * w_dw[j:j + 1, :]

    # Eval-mode BatchNorm (folded scale/shift), applied only to valid rows.
    bn = acc * bns_ref[...] + bnb_ref[...]
    xbn = jnp.where(ma, bn, acc)

    # Swish
    sw = xbn * _sigmoid(xbn)

    # Pointwise conv 2 + final masked_fill (dropout is identity in eval mode).
    y2 = jnp.dot(sw.astype(jnp.bfloat16), w2_ref[...],
                 preferred_element_type=jnp.float32) + b2_ref[...]
    o_ref[0] = jnp.where(ma, y2, 0.0).astype(o_ref.dtype)


def conv_module_pallas(x, lengths, kparams, kernel_size):
    """x: (B, T, C) f32, lengths: (B,) int (#valid frames). Returns (B, T//4, C) f32."""
    B, T, C = x.shape
    K = kernel_size
    assert T % 4 == 0, "demo assumes T divisible by 4"
    assert (K - 1) % 2 == 0, "kernel_size must be odd for 'SAME' padding"
    T4 = T // 4
    pad = (K - 1) // 2
    PE = (pad + 1) // 2

    # (B, T, C) -> (B, T4, 4C): lanes [0:C] hold rows 4i, lanes [2C:3C] hold rows 4i+2.
    # Only those two lane slices are DMA'd (half the x HBM traffic).
    x4 = x.astype(jnp.bfloat16).reshape(B, T4, 4 * C)
    lengths = lengths.astype(jnp.int32)

    def const(shape):
        return pl.BlockSpec(shape, lambda b, lens: (0, 0))

    grid_spec = pltpu.PrefetchScalarGridSpec(
        num_scalar_prefetch=1,
        grid=(B,),
        in_specs=[
            pl.BlockSpec((1, T4, C), lambda b, lens: (b, 0, 0)),   # x rows 4i
            pl.BlockSpec((1, T4, C), lambda b, lens: (b, 0, 2)),   # x rows 4i+2
            const((C, 2 * C)), const((1, 2 * C)),                  # pw1 fused weight/bias
            const((K, C)),                                         # depthwise taps
            const((1, C)), const((1, C)),                          # folded BN scale/shift
            const((C, C)), const((1, C)),                          # pw2 weight/bias
        ],
        out_specs=pl.BlockSpec((1, T4, C), lambda b, lens: (b, 0, 0)),
        scratch_shapes=[pltpu.VMEM((T4 + 2 * PE, C), jnp.float32),
                        pltpu.VMEM((T4 + 2 * PE, C), jnp.float32)],
    )

    return pl.pallas_call(
        partial(_conv_module_kernel, channels=C, kernel_size=K, t4=T4),
        grid_spec=grid_spec,
        out_shape=jax.ShapeDtypeStruct((B, T4, C), jnp.float32),
        compiler_params=pltpu.CompilerParams(
            dimension_semantics=("parallel",),
            vmem_limit_bytes=32 * 1024 * 1024),
    )(lengths, x4, x4,
      kparams["w1"], kparams["b1"], kparams["wdw"],
      kparams["bn_scale"], kparams["bn_shift"],
      kparams["w2"], kparams["b2"])


# -----------------------------------------------------------------------------
# Parameter packing: torch-layout params -> kernel-layout params
# -----------------------------------------------------------------------------
def pack_params(tp, eps=1e-5):
    scale = tp["bn_gamma"] / jnp.sqrt(tp["bn_var"] + eps)
    shift = tp["bn_beta"] - tp["bn_mean"] * scale
    return {
        "w1": tp["pw1_w"][:, :, 0].T.astype(jnp.bfloat16),   # (C, 2C) MXU operand
        "b1": tp["pw1_b"][None, :].astype(jnp.float32),      # (1, 2C)
        "wdw": tp["dw_w"][:, 0, :].T.astype(jnp.float32),    # (K, C)  VPU taps
        "bn_scale": scale[None, :].astype(jnp.float32),      # (1, C)
        "bn_shift": shift[None, :].astype(jnp.float32),      # (1, C)
        "w2": tp["pw2_w"][:, :, 0].T.astype(jnp.bfloat16),   # (C, C)  MXU operand
        "b2": tp["pw2_b"][None, :].astype(jnp.float32),      # (1, C)
    }


# -----------------------------------------------------------------------------
# Pure-JAX f32 reference matching the PyTorch forward (eval mode, dropout identity)
# -----------------------------------------------------------------------------
def reference_forward(x, mask, tp, kernel_size, eps=1e-5):
    B, T, C = x.shape
    K = kernel_size
    pad = (K - 1) // 2
    T2 = T // 2

    xt = jnp.transpose(x, (0, 2, 1))                         # (B, C, T)
    xt = jnp.where(mask[:, None, :], xt, 0.0)                # masked_fill

    # pw_conv_1: Conv1d(C, 2C, k=1, stride=2) on even time positions
    w1 = tp["pw1_w"][:, :, 0]                                # (2C, C)
    y = jnp.einsum("oc,bct->bot", w1, xt[:, :, ::2]) + tp["pw1_b"][None, :, None]
    outp, gate = y[:, :C], y[:, C:]
    g = outp * jax.nn.sigmoid(gate)                          # GLU -> (B, C, T2)

    # depthwise conv, SAME padding
    gpad = jnp.pad(g, ((0, 0), (0, 0), (pad, pad)))
    dw = jnp.zeros_like(g)
    for k in range(K):
        dw = dw + tp["dw_w"][:, 0, k][None, :, None] * gpad[:, :, k:k + T2]

    # BatchNorm (eval) applied only to valid rows
    mask2 = mask[:, ::2]
    scale = tp["bn_gamma"] / jnp.sqrt(tp["bn_var"] + eps)
    shift = tp["bn_beta"] - tp["bn_mean"] * scale
    bn = dw * scale[None, :, None] + shift[None, :, None]
    dw = jnp.where(mask2[:, None, :], bn, dw)

    sw = dw * jax.nn.sigmoid(dw)                             # Swish

    # pw_conv_2: Conv1d(C, C, k=1, stride=2)
    w2 = tp["pw2_w"][:, :, 0]
    y2 = jnp.einsum("oc,bct->bot", w2, sw[:, :, ::2]) + tp["pw2_b"][None, :, None]
    mask4 = mask2[:, ::2]
    y2 = jnp.where(mask4[:, None, :], y2, 0.0)
    return jnp.transpose(y2, (0, 2, 1))                      # (B, T//4, C)


# -----------------------------------------------------------------------------
# Main
# -----------------------------------------------------------------------------
if __name__ == "__main__":
    B, T, C, K = 2, 16, 128, 7        # batch, time, channels, depthwise kernel (odd)

    key = jax.random.PRNGKey(0)
    ks = jax.random.split(key, 10)
    torch_params = {
        "pw1_w": jax.random.normal(ks[0], (2 * C, C, 1), jnp.float32) / math.sqrt(C),
        "pw1_b": jax.random.normal(ks[1], (2 * C,), jnp.float32) * 0.02,
        "dw_w":  jax.random.normal(ks[2], (C, 1, K), jnp.float32) / math.sqrt(K),
        "bn_gamma": 1.0 + 0.1 * jax.random.normal(ks[3], (C,), jnp.float32),
        "bn_beta": 0.02 * jax.random.normal(ks[4], (C,), jnp.float32),
        "bn_mean": 0.1 * jax.random.normal(ks[5], (C,), jnp.float32),
        "bn_var": jnp.abs(jax.random.normal(ks[6], (C,), jnp.float32)) + 0.5,
        "pw2_w": jax.random.normal(ks[7], (C, C, 1), jnp.float32) / math.sqrt(C),
        "pw2_b": jax.random.normal(ks[8], (C,), jnp.float32) * 0.02,
    }
    x = jax.random.normal(ks[9], (B, T, C), jnp.float32)

    # padding: batch 0 fully valid, batch 1 valid for the first 12 frames
    lengths = jnp.array([16, 12], dtype=jnp.int32)
    mask = jnp.arange(T)[None, :] < lengths[:, None]          # (B, T) bool (reference only)

    kparams = pack_params(torch_params)
    out = conv_module_pallas(x, lengths, kparams, kernel_size=K)
    out = jax.block_until_ready(out)

    ref = reference_forward(x, mask, torch_params, kernel_size=K)
    # tolerance relaxed vs. pure-f32: MXU operands are bf16 (f32 accumulation)
    np.testing.assert_allclose(np.asarray(out), np.asarray(ref), rtol=5e-2, atol=5e-2)

    print("KERNEL_OK")
</pallas_src>

<mosaic_0001>
module attributes {stable_mosaic.version = 11 : i64} {
  func.func @_conv_module_kernel(%arg0: i32, %arg1: memref<2xi32, #tpu.memory_space<smem>>, %arg2: memref<1x4x128xbf16, #tpu.memory_space<vmem>>, %arg3: memref<1x4x128xbf16, #tpu.memory_space<vmem>>, %arg4: memref<128x256xbf16, #tpu.memory_space<vmem>>, %arg5: memref<1x256xf32, #tpu.memory_space<vmem>>, %arg6: memref<7x128xf32, #tpu.memory_space<vmem>>, %arg7: memref<1x128xf32, #tpu.memory_space<vmem>>, %arg8: memref<1x128xf32, #tpu.memory_space<vmem>>, %arg9: memref<128x128xbf16, #tpu.memory_space<vmem>>, %arg10: memref<1x128xf32, #tpu.memory_space<vmem>>, %arg11: memref<1x4x128xf32, #tpu.memory_space<vmem>>, %arg12: memref<8x128xf32, #tpu.memory_space<vmem>>, %arg13: memref<8x128xf32, #tpu.memory_space<vmem>>) attributes {dimension_semantics = [#tpu.dimension_semantics<parallel>], iteration_bounds = array<i64: 2>, scalar_prefetch = 1 : i64, scratch_operands = 2 : i64, tpu.core_type = #tpu.core_type<tc>, window_params = [{transform_indices = @transform_0, window_bounds = array<i64: 1, 4, 128>}, {transform_indices = @transform_1, window_bounds = array<i64: 1, 4, 128>}, {pipeline_mode = #tpu.pipeline_mode<synchronous>, transform_indices = @transform_2, window_bounds = array<i64: 128, 256>}, {pipeline_mode = #tpu.pipeline_mode<synchronous>, transform_indices = @transform_3, window_bounds = array<i64: 1, 256>}, {pipeline_mode = #tpu.pipeline_mode<synchronous>, transform_indices = @transform_4, window_bounds = array<i64: 7, 128>}, {pipeline_mode = #tpu.pipeline_mode<synchronous>, transform_indices = @transform_5, window_bounds = array<i64: 1, 128>}, {pipeline_mode = #tpu.pipeline_mode<synchronous>, transform_indices = @transform_6, window_bounds = array<i64: 1, 128>}, {pipeline_mode = #tpu.pipeline_mode<synchronous>, transform_indices = @transform_7, window_bounds = array<i64: 128, 128>}, {pipeline_mode = #tpu.pipeline_mode<synchronous>, transform_indices = @transform_8, window_bounds = array<i64: 1, 128>}, {transform_indices = @transform_9, window_bounds = array<i64: 1, 4, 128>}]} {
    %0 = arith.index_cast %arg0 : i32 to index
    %1 = memref.load %arg1[%0] : memref<2xi32, #tpu.memory_space<smem>>
    %2 = tpu.iota {dimensions = array<i32: 0>} : vector<4x1xi32>
    %c4_i32 = arith.constant 4 : i32
    %3 = vector.broadcast %c4_i32 : i32 to vector<4x1xi32>
    %4 = arith.muli %3, %2 : vector<4x1xi32>
    %5 = vector.broadcast %1 : i32 to vector<4x1xi32>
    %6 = arith.cmpi slt, %4, %5 : vector<4x1xi32>
    %c4_i32_0 = arith.constant 4 : i32
    %7 = vector.broadcast %c4_i32_0 : i32 to vector<4x1xi32>
    %8 = arith.muli %7, %2 : vector<4x1xi32>
    %c2_i32 = arith.constant 2 : i32
    %9 = vector.broadcast %c2_i32 : i32 to vector<4x1xi32>
    %10 = arith.addi %8, %9 : vector<4x1xi32>
    %11 = vector.broadcast %1 : i32 to vector<4x1xi32>
    %12 = arith.cmpi slt, %10, %11 : vector<4x1xi32>
    %c0 = arith.constant 0 : index
    %c0_1 = arith.constant 0 : index
    %c0_2 = arith.constant 0 : index
    %13 = vector.load %arg2[%c0, %c0_1, %c0_2] : memref<1x4x128xbf16, #tpu.memory_space<vmem>>, vector<1x4x128xbf16>
    %14 = vector.shape_cast %13 : vector<1x4x128xbf16> to vector<4x128xbf16>
    %cst = arith.constant 0.000000e+00 : f32
    %15 = arith.truncf %cst : f32 to bf16
    %16 = vector.shape_cast %6 : vector<4x1xi1> to vector<4x1xi1>
    %17 = vector.broadcast %16 : vector<4x1xi1> to vector<4x128xi1>
    %18 = vector.broadcast %15 : bf16 to vector<4x128xbf16>
    %19 = arith.select %17, %14, %18 : vector<4x128xi1>, vector<4x128xbf16>
    %c0_3 = arith.constant 0 : index
    %c0_4 = arith.constant 0 : index
    %c0_5 = arith.constant 0 : index
    %20 = vector.load %arg3[%c0_3, %c0_4, %c0_5] : memref<1x4x128xbf16, #tpu.memory_space<vmem>>, vector<1x4x128xbf16>
    %21 = vector.shape_cast %20 : vector<1x4x128xbf16> to vector<4x128xbf16>
    %cst_6 = arith.constant 0.000000e+00 : f32
    %22 = arith.truncf %cst_6 : f32 to bf16
    %23 = vector.shape_cast %12 : vector<4x1xi1> to vector<4x1xi1>
    %24 = vector.broadcast %23 : vector<4x1xi1> to vector<4x128xi1>
    %25 = vector.broadcast %22 : bf16 to vector<4x128xbf16>
    %26 = arith.select %24, %21, %25 : vector<4x128xi1>, vector<4x128xbf16>
    %c0_7 = arith.constant 0 : index
    %c0_8 = arith.constant 0 : index
    %27 = vector.load %arg4[%c0_7, %c0_8] : memref<128x256xbf16, #tpu.memory_space<vmem>>, vector<128x256xbf16>
    %c0_9 = arith.constant 0 : index
    %c0_10 = arith.constant 0 : index
    %28 = vector.load %arg5[%c0_9, %c0_10] : memref<1x256xf32, #tpu.memory_space<vmem>>, vector<1x256xf32>
    %cst_11 = arith.constant dense<0.000000e+00> : vector<4x256xf32>
    %29 = tpu.matmul %19, %27, %cst_11 {dimension_numbers = #tpu.dot_dimension_numbers<[1], [0], [0], [1], [0, 0, 1, 1], [], []>} : vector<4x128xbf16>, vector<128x256xbf16>, vector<4x256xf32> -> vector<4x256xf32>
    %30 = vector.broadcast %28 : vector<1x256xf32> to vector<4x256xf32>
    %31 = arith.addf %29, %30 : vector<4x256xf32>
    %cst_12 = arith.constant dense<0.000000e+00> : vector<4x256xf32>
    %32 = tpu.matmul %26, %27, %cst_12 {dimension_numbers = #tpu.dot_dimension_numbers<[1], [0], [0], [1], [0, 0, 1, 1], [], []>} : vector<4x128xbf16>, vector<128x256xbf16>, vector<4x256xf32> -> vector<4x256xf32>
    %33 = vector.broadcast %28 : vector<1x256xf32> to vector<4x256xf32>
    %34 = arith.addf %32, %33 : vector<4x256xf32>
    %35 = vector.extract_strided_slice %31 {offsets = [0, 0], sizes = [4, 128], strides = [1, 1]} : vector<4x256xf32> to vector<4x128xf32>
    %36 = vector.extract_strided_slice %31 {offsets = [0, 128], sizes = [4, 128], strides = [1, 1]} : vector<4x256xf32> to vector<4x128xf32>
    %cst_13 = arith.constant 0.000000e+00 : f32
    %37 = vector.broadcast %cst_13 : f32 to vector<4x128xf32>
    %38 = arith.subf %37, %36 : vector<4x128xf32>
    %39 = math.exp %38 : vector<4x128xf32>
    %cst_14 = arith.constant 1.000000e+00 : f32
    %40 = vector.broadcast %cst_14 : f32 to vector<4x128xf32>
    %41 = arith.addf %40, %39 : vector<4x128xf32>
    %42 = tpu.reciprocal %41 {approx = true} : vector<4x128xf32> -> vector<4x128xf32>
    %43 = arith.mulf %35, %42 : vector<4x128xf32>
    %44 = vector.extract_strided_slice %34 {offsets = [0, 0], sizes = [4, 128], strides = [1, 1]} : vector<4x256xf32> to vector<4x128xf32>
    %45 = vector.extract_strided_slice %34 {offsets = [0, 128], sizes = [4, 128], strides = [1, 1]} : vector<4x256xf32> to vector<4x128xf32>
    %cst_15 = arith.constant 0.000000e+00 : f32
    %46 = vector.broadcast %cst_15 : f32 to vector<4x128xf32>
    %47 = arith.subf %46, %45 : vector<4x128xf32>
    %48 = math.exp %47 : vector<4x128xf32>
    %cst_16 = arith.constant 1.000000e+00 : f32
    %49 = vector.broadcast %cst_16 : f32 to vector<4x128xf32>
    %50 = arith.addf %49, %48 : vector<4x128xf32>
    %51 = tpu.reciprocal %50 {approx = true} : vector<4x128xf32> -> vector<4x128xf32>
    %52 = arith.mulf %44, %51 : vector<4x128xf32>
    %cst_17 = arith.constant 0.000000e+00 : f32
    %53 = vector.broadcast %cst_17 : f32 to vector<2x128xf32>
    %c0_18 = arith.constant 0 : index
    %c0_19 = arith.constant 0 : index
    %54 = vector.load %arg12[%c0_18, %c0_19] : memref<8x128xf32, #tpu.memory_space<vmem>>, vector<2x128xf32>
    tpu.vector_store %arg12[%c0_18, %c0_19], %53 {strides = array<i32>} : memref<8x128xf32, #tpu.memory_space<vmem>>, vector<2x128xf32>,
    %c6 = arith.constant 6 : index
    %c0_20 = arith.constant 0 : index
    %55 = vector.load %arg12[%c6, %c0_20] : memref<8x128xf32, #tpu.memory_space<vmem>>, vector<2x128xf32>
    tpu.vector_store %arg12[%c6, %c0_20], %53 {strides = array<i32>} : memref<8x128xf32, #tpu.memory_space<vmem>>, vector<2x128xf32>,
    %c0_21 = arith.constant 0 : index
    %c0_22 = arith.constant 0 : index
    %56 = vector.load %arg13[%c0_21, %c0_22] : memref<8x128xf32, #tpu.memory_space<vmem>>, vector<2x128xf32>
    tpu.vector_store %arg13[%c0_21, %c0_22], %53 {strides = array<i32>} : memref<8x128xf32, #tpu.memory_space<vmem>>, vector<2x128xf32>,
    %c6_23 = arith.constant 6 : index
    %c0_24 = arith.constant 0 : index
    %57 = vector.load %arg13[%c6_23, %c0_24] : memref<8x128xf32, #tpu.memory_space<vmem>>, vector<2x128xf32>
    tpu.vector_store %arg13[%c6_23, %c0_24], %53 {strides = array<i32>} : memref<8x128xf32, #tpu.memory_space<vmem>>, vector<2x128xf32>,
    %c2 = arith.constant 2 : index
    %c0_25 = arith.constant 0 : index
    %58 = vector.load %arg12[%c2, %c0_25] : memref<8x128xf32, #tpu.memory_space<vmem>>, vector<4x128xf32>
    tpu.vector_store %arg12[%c2, %c0_25], %43 {strides = array<i32>} : memref<8x128xf32, #tpu.memory_space<vmem>>, vector<4x128xf32>,
    %c2_26 = arith.constant 2 : index
    %c0_27 = arith.constant 0 : index
    %59 = vector.load %arg13[%c2_26, %c0_27] : memref<8x128xf32, #tpu.memory_space<vmem>>, vector<4x128xf32>
    tpu.vector_store %arg13[%c2_26, %c0_27], %52 {strides = array<i32>} : memref<8x128xf32, #tpu.memory_space<vmem>>, vector<4x128xf32>,
    %c0_28 = arith.constant 0 : index
    %c0_29 = arith.constant 0 : index
    %60 = vector.load %arg6[%c0_28, %c0_29] : memref<7x128xf32, #tpu.memory_space<vmem>>, vector<7x128xf32>
    %cst_30 = arith.constant 0.000000e+00 : f32
    %61 = vector.broadcast %cst_30 : f32 to vector<4x128xf32>
    %c0_31 = arith.constant 0 : index
    %c0_32 = arith.constant 0 : index
    %62 = vector.load %arg13[%c0_31, %c0_32] : memref<8x128xf32, #tpu.memory_space<vmem>>, vector<4x128xf32>
    %63 = vector.extract_strided_slice %60 {offsets = [0, 0], sizes = [1, 128], strides = [1, 1]} : vector<7x128xf32> to vector<1x128xf32>
    %64 = vector.broadcast %63 : vector<1x128xf32> to vector<4x128xf32>
    %65 = arith.mulf %62, %64 : vector<4x128xf32>
    %66 = arith.addf %61, %65 : vector<4x128xf32>
    %c1 = arith.constant 1 : index
    %c0_33 = arith.constant 0 : index
    %67 = vector.load %arg12[%c1, %c0_33] : memref<8x128xf32, #tpu.memory_space<vmem>>, vector<4x128xf32>
    %68 = vector.extract_strided_slice %60 {offsets = [1, 0], sizes = [1, 128], strides = [1, 1]} : vector<7x128xf32> to vector<1x128xf32>
    %69 = vector.broadcast %68 : vector<1x128xf32> to vector<4x128xf32>
    %70 = arith.mulf %67, %69 : vector<4x128xf32>
    %71 = arith.addf %66, %70 : vector<4x128xf32>
    %c1_34 = arith.constant 1 : index
    %c0_35 = arith.constant 0 : index
    %72 = vector.load %arg13[%c1_34, %c0_35] : memref<8x128xf32, #tpu.memory_space<vmem>>, vector<4x128xf32>
    %73 = vector.extract_strided_slice %60 {offsets = [2, 0], sizes = [1, 128], strides = [1, 1]} : vector<7x128xf32> to vector<1x128xf32>
    %74 = vector.broadcast %73 : vector<1x128xf32> to vector<4x128xf32>
    %75 = arith.mulf %72, %74 : vector<4x128xf32>
    %76 = arith.addf %71, %75 : vector<4x128xf32>
    %c2_36 = arith.constant 2 : index
    %c0_37 = arith.constant 0 : index
    %77 = vector.load %arg12[%c2_36, %c0_37] : memref<8x128xf32, #tpu.memory_space<vmem>>, vector<4x128xf32>
    %78 = vector.extract_strided_slice %60 {offsets = [3, 0], sizes = [1, 128], strides = [1, 1]} : vector<7x128xf32> to vector<1x128xf32>
    %79 = vector.broadcast %78 : vector<1x128xf32> to vector<4x128xf32>
    %80 = arith.mulf %77, %79 : vector<4x128xf32>
    %81 = arith.addf %76, %80 : vector<4x128xf32>
    %c2_38 = arith.constant 2 : index
    %c0_39 = arith.constant 0 : index
    %82 = vector.load %arg13[%c2_38, %c0_39] : memref<8x128xf32, #tpu.memory_space<vmem>>, vector<4x128xf32>
    %83 = vector.extract_strided_slice %60 {offsets = [4, 0], sizes = [1, 128], strides = [1, 1]} : vector<7x128xf32> to vector<1x128xf32>
    %84 = vector.broadcast %83 : vector<1x128xf32> to vector<4x128xf32>
    %85 = arith.mulf %82, %84 : vector<4x128xf32>
    %86 = arith.addf %81, %85 : vector<4x128xf32>
    %c3 = arith.constant 3 : index
    %c0_40 = arith.constant 0 : index
    %87 = vector.load %arg12[%c3, %c0_40] : memref<8x128xf32, #tpu.memory_space<vmem>>, vector<4x128xf32>
    %88 = vector.extract_strided_slice %60 {offsets = [5, 0], sizes = [1, 128], strides = [1, 1]} : vector<7x128xf32> to vector<1x128xf32>
    %89 = vector.broadcast %88 : vector<1x128xf32> to vector<4x128xf32>
    %90 = arith.mulf %87, %89 : vector<4x128xf32>
    %91 = arith.addf %86, %90 : vector<4x128xf32>
    %c3_41 = arith.constant 3 : index
    %c0_42 = arith.constant 0 : index
    %92 = vector.load %arg13[%c3_41, %c0_42] : memref<8x128xf32, #tpu.memory_space<vmem>>, vector<4x128xf32>
    %93 = vector.extract_strided_slice %60 {offsets = [6, 0], sizes = [1, 128], strides = [1, 1]} : vector<7x128xf32> to vector<1x128xf32>
    %94 = vector.broadcast %93 : vector<1x128xf32> to vector<4x128xf32>
    %95 = arith.mulf %92, %94 : vector<4x128xf32>
    %96 = arith.addf %91, %95 : vector<4x128xf32>
    %c0_43 = arith.constant 0 : index
    %c0_44 = arith.constant 0 : index
    %97 = vector.load %arg7[%c0_43, %c0_44] : memref<1x128xf32, #tpu.memory_space<vmem>>, vector<1x128xf32>
    %98 = vector.broadcast %97 : vector<1x128xf32> to vector<4x128xf32>
    %99 = arith.mulf %96, %98 : vector<4x128xf32>
    %c0_45 = arith.constant 0 : index
    %c0_46 = arith.constant 0 : index
    %100 = vector.load %arg8[%c0_45, %c0_46] : memref<1x128xf32, #tpu.memory_space<vmem>>, vector<1x128xf32>
    %101 = vector.broadcast %100 : vector<1x128xf32> to vector<4x128xf32>
    %102 = arith.addf %99, %101 : vector<4x128xf32>
    %103 = vector.shape_cast %6 : vector<4x1xi1> to vector<4x1xi1>
    %104 = vector.broadcast %103 : vector<4x1xi1> to vector<4x128xi1>
    %105 = arith.select %104, %102, %96 : vector<4x128xi1>, vector<4x128xf32>
    %cst_47 = arith.constant 0.000000e+00 : f32
    %106 = vector.broadcast %cst_47 : f32 to vector<4x128xf32>
    %107 = arith.subf %106, %105 : vector<4x128xf32>
    %108 = math.exp %107 : vector<4x128xf32>
    %cst_48 = arith.constant 1.000000e+00 : f32
    %109 = vector.broadcast %cst_48 : f32 to vector<4x128xf32>
    %110 = arith.addf %109, %108 : vector<4x128xf32>
    %111 = tpu.reciprocal %110 {approx = true} : vector<4x128xf32> -> vector<4x128xf32>
    %112 = arith.mulf %105, %111 : vector<4x128xf32>
    %113 = arith.truncf %112 : vector<4x128xf32> to vector<4x128xbf16>
    %c0_49 = arith.constant 0 : index
    %c0_50 = arith.constant 0 : index
    %114 = vector.load %arg9[%c0_49, %c0_50] : memref<128x128xbf16, #tpu.memory_space<vmem>>, vector<128x128xbf16>
    %cst_51 = arith.constant dense<0.000000e+00> : vector<4x128xf32>
    %115 = tpu.matmul %113, %114, %cst_51 {dimension_numbers = #tpu.dot_dimension_numbers<[1], [0], [0], [1], [0, 0, 1, 1], [], []>} : vector<4x128xbf16>, vector<128x128xbf16>, vector<4x128xf32> -> vector<4x128xf32>
    %c0_52 = arith.constant 0 : index
    %c0_53 = arith.constant 0 : index
    %116 = vector.load %arg10[%c0_52, %c0_53] : memref<1x128xf32, #tpu.memory_space<vmem>>, vector<1x128xf32>
    %117 = vector.broadcast %116 : vector<1x128xf32> to vector<4x128xf32>
    %118 = arith.addf %115, %117 : vector<4x128xf32>
    %cst_54 = arith.constant 0.000000e+00 : f32
    %119 = vector.shape_cast %6 : vector<4x1xi1> to vector<4x1xi1>
    %120 = vector.broadcast %119 : vector<4x1xi1> to vector<4x128xi1>
    %121 = vector.broadcast %cst_54 : f32 to vector<4x128xf32>
    %122 = arith.select %120, %118, %121 : vector<4x128xi1>, vector<4x128xf32>
    %c0_55 = arith.constant 0 : index
    %c0_56 = arith.constant 0 : index
    %c0_57 = arith.constant 0 : index
    %123 = vector.load %arg11[%c0_55, %c0_56, %c0_57] : memref<1x4x128xf32, #tpu.memory_space<vmem>>, vector<1x4x128xf32>
    %124 = vector.shape_cast %123 : vector<1x4x128xf32> to vector<4x128xf32>
    %125 = vector.shape_cast %122 : vector<4x128xf32> to vector<1x4x128xf32>
    tpu.vector_store %arg11[%c0_55, %c0_56, %c0_57], %125 {strides = array<i32>} : memref<1x4x128xf32, #tpu.memory_space<vmem>>, vector<1x4x128xf32>,
    return
  }
  func.func @transform_0(%arg0: i32, %arg1: memref<2xi32, #tpu.memory_space<smem>>) -> (i32, i32, i32) {
    %c0_i32 = arith.constant 0 : i32
    %c0_i32_0 = arith.constant 0 : i32
    %c0_i32_1 = arith.constant 0 : i32
    return %arg0, %c0_i32, %c0_i32_0 : i32, i32, i32
  }
  func.func @transform_1(%arg0: i32, %arg1: memref<2xi32, #tpu.memory_space<smem>>) -> (i32, i32, i32) {
    %c0_i32 = arith.constant 0 : i32
    %c2_i32 = arith.constant 2 : i32
    %c0_i32_0 = arith.constant 0 : i32
    return %arg0, %c0_i32, %c2_i32 : i32, i32, i32
  }
  func.func @transform_2(%arg0: i32, %arg1: memref<2xi32, #tpu.memory_space<smem>>) -> (i32, i32) {
    %c0_i32 = arith.constant 0 : i32
    %c0_i32_0 = arith.constant 0 : i32
    %c0_i32_1 = arith.constant 0 : i32
    return %c0_i32, %c0_i32_0 : i32, i32
  }
  func.func @transform_3(%arg0: i32, %arg1: memref<2xi32, #tpu.memory_space<smem>>) -> (i32, i32) {
    %c0_i32 = arith.constant 0 : i32
    %c0_i32_0 = arith.constant 0 : i32
    %c0_i32_1 = arith.constant 0 : i32
    return %c0_i32, %c0_i32_0 : i32, i32
  }
  func.func @transform_4(%arg0: i32, %arg1: memref<2xi32, #tpu.memory_space<smem>>) -> (i32, i32) {
    %c0_i32 = arith.constant 0 : i32
    %c0_i32_0 = arith.constant 0 : i32
    %c0_i32_1 = arith.constant 0 : i32
    return %c0_i32, %c0_i32_0 : i32, i32
  }
  func.func @transform_5(%arg0: i32, %arg1: memref<2xi32, #tpu.memory_space<smem>>) -> (i32, i32) {
    %c0_i32 = arith.constant 0 : i32
    %c0_i32_0 = arith.constant 0 : i32
    %c0_i32_1 = arith.constant 0 : i32
    return %c0_i32, %c0_i32_0 : i32, i32
  }
  func.func @transform_6(%arg0: i32, %arg1: memref<2xi32, #tpu.memory_space<smem>>) -> (i32, i32) {
    %c0_i32 = arith.constant 0 : i32
    %c0_i32_0 = arith.constant 0 : i32
    %c0_i32_1 = arith.constant 0 : i32
    return %c0_i32, %c0_i32_0 : i32, i32
  }
  func.func @transform_7(%arg0: i32, %arg1: memref<2xi32, #tpu.memory_space<smem>>) -> (i32, i32) {
    %c0_i32 = arith.constant 0 : i32
    %c0_i32_0 = arith.constant 0 : i32
    %c0_i32_1 = arith.constant 0 : i32
    return %c0_i32, %c0_i32_0 : i32, i32
  }
  func.func @transform_8(%arg0: i32, %arg1: memref<2xi32, #tpu.memory_space<smem>>) -> (i32, i32) {
    %c0_i32 = arith.constant 0 : i32
    %c0_i32_0 = arith.constant 0 : i32
    %c0_i32_1 = arith.constant 0 : i32
    return %c0_i32, %c0_i32_0 : i32, i32
  }
  func.func @transform_9(%arg0: i32, %arg1: memref<2xi32, #tpu.memory_space<smem>>) -> (i32, i32, i32) {
    %c0_i32 = arith.constant 0 : i32
    %c0_i32_0 = arith.constant 0 : i32
    %c0_i32_1 = arith.constant 0 : i32
    return %arg0, %c0_i32, %c0_i32_0 : i32, i32, i32
  }
}

</mosaic_0001>

<bundles_post_ra>
// kernel: tpu_custom_call.1
= control target key start
LH: loop header
LB: loop body
LE: loop exit
PB: predicated region body
PF: predicated region fallthrough
CT: control target
= control target key end

     0   :  { %s1422_s16 = smov [#allocation5]   ;;  %s1732_s0 = inlined_call_operand.hbm [shape: s32[2], index: 0, kind: input, shape index: {}]   ;;  %s1733_s1 = inlined_call_operand.hbm [shape: bf16[2,4,512], index: 1, kind: input, shape index: {}]   ;;  %s1734_s2 = inlined_call_operand.hbm [shape: bf16[2,4,512], index: 2, kind: input, shape index: {}]   ;;  %s1735_s3 = inlined_call_operand.hbm [shape: bf16[128,256], index: 3, kind: input, shape index: {}]   ;;  %s1736_s4 = inlined_call_operand.vmem [shape: f32[1,256], index: 4, kind: input, shape index: {}]   ;;  %s1737_s5 = inlined_call_operand.hbm [shape: f32[7,128], index: 5, kind: input, shape index: {}]   ;;  %s1738_s6 = inlined_call_operand.vmem [shape: f32[1,128], index: 6, kind: input, shape index: {}]   ;;  %s1739_s7 = inlined_call_operand.vmem [shape: f32[1,128], index: 7, kind: input, shape index: {}]   ;;  %s1740_s8 = inlined_call_operand.hbm [shape: bf16[128,128], index: 8, kind: input, shape index: {}]   ;;  %s1741_s9 = inlined_call_operand.vmem [shape: f32[1,128], index: 9, kind: input, shape index: {}]   ;;  %s1742_s10 = inlined_call_operand.hbm [shape: f32[2,4,128], index: 10, kind: output, shape index: {}]  }
   0x1   :  { %1749 = sst [smem:[#allocation28_spill]] %s1735_s3  ;;  %s16_s15 = sshll.u32 %s1732_s0, 4  ;;  %s17_s15 = int_to_ptr.hbm [resolvable:$true] %s16_s15 }
   0x2   :  { %1750 = sst [smem:[#allocation29_spill]] %s1737_s5 }
   0x3   :  { %1751 = sst [smem:[#allocation30_spill]] %s1740_s8 }
   0x4   :  { %19 = dma.hbm_to_smem %s17_s15, 16, %s1422_s16, [#allocation4] }
   0x5   :  { %1384 = dma.done.wait [#allocation4], 16 }
   0x6   :  { %1385 = vsyncadd [#allocation4], 4294967280 }
   0x7   :  { %22 = sfence }
   0x8   :  { %23 = vsyncpa [#allocation7], 0 }
   0x9   :  { %25 = vsyncpa [#allocation7 + $0x1], 0 }
   0xa   :  { %26 = vsyncpa [#allocation10], 0 }
   0xb   :  { %28 = vsyncpa [#allocation10 + $0x1], 0 }
   0xc   :  { %29 = vsyncpa [#allocation13], 0 }
   0xd   :  { %30 = vsyncpa [#allocation8], 0 }
   0xe   :  { %32 = vsyncpa [#allocation8 + $0x1], 0  ;;  %s1490_s17 = smov 0   ;;  %s1492_s18 = smov 0  }
   0xf   :  { %s1494_s19 = smov 0   ;;  %s1496_s0 = smov 0  }
  0x10 LB: > { %1752 = sst [smem:[#allocation22_spill]] %s1408_s17  ;;  %s1514_s23 = sadd.s32 4294967295, %s1420_s0   ;;  %s1420_s0 = sphi %s1496_s0, %s1782_s0   ;;  %s1416_s19 = sphi %s1494_s19, %s1784_s19   ;;  %s1412_s18 = sphi %s1492_s18, %s1786_s18   ;;  %s1408_s17 = sphi %s1490_s17, %s1785_s17  }
  0x11   : > { %1753 = sst [smem:[#allocation23_spill]] %s1416_s19  ;;  %p926_p0 = scmp.ge.s32.totalorder %s1420_s0, 1 }
  0x12   : > { %1754 = sst [smem:[#allocation24_spill]] %s1420_s0  ;;  %p59_p1 = scmp.eq.s32.totalorder %s1514_s23, 0 }
  0x13   : > { %s1755_s3 = sld [smem:[#allocation28_spill]]  ;;  %p268_p2 = scmp.lt.s32.totalorder %s1420_s0, 3 }
  0x14   : > { %s1423_s25 = smov [#allocation11]   ;;  %s1757_s5 = sld [smem:[#allocation29_spill]] }
  0x15   : > { %p1519_p3 = pnand %p926_p0, %p268_p2  ;;  %s281_s26 = sshll.u32 %s1423_s25, 4  ;;  %s282_s26 = int_to_ptr.vmem [resolvable:$true] %s281_s26 }
  0x16   : > { %s1759_s8 = sld [smem:[#allocation30_spill]]  ;;  %s1424_s14 = smov [#allocation12]  }
  0x17   : > { %p1092_p4 = pneg %p1519_p3  ;;  %s299_s15 = sshll.u32 %s1424_s14, 4  ;;  %s300_s15 = int_to_ptr.vmem [resolvable:$true] %s299_s15 }
  0x18   : > { %s1425_s16 = smov 128   ;;  %s1426_s20 = smov 8  }
  0x19   : > { %s279_s22 = sshll.u32 %s1755_s3, 4  ;;  %p1531_p6 = pnand %p1092_p4, %p59_p1  ;;  %s280_s22 = int_to_ptr.hbm [resolvable:$true] %s279_s22 }
  0x1a   : > { %s297_s29 = sshll.u32 %s1757_s5, 4  ;;  %s1427_s21 = smov [#allocation14]   ;;  %s298_s29 = int_to_ptr.hbm [resolvable:$true] %s297_s29 }
  0x1b   : > { %1095 = dma.hbm_to_vmem [thread:$0]  (!%p1531_p6), %s280_s22, 2048, %s282_s26, [#allocation10], %s1425_s16, %s1425_s16, %s1426_s20  }
  0x1c   : > { %s314_s13 = sshll.u32 %s1759_s8, 4  ;;  %s316_s25 = sshll.u32 %s1427_s21, 4  ;;  %s315_s13 = int_to_ptr.hbm [resolvable:$true] %s314_s13  ;;  %s317_s25 = int_to_ptr.vmem [resolvable:$true] %s316_s25 }
  0x1d   : > { %1098 = dma.hbm_to_vmem [thread:$0]  (!%p1531_p6), %s298_s29, 128, %s300_s15, [#allocation13]  }
  0x1e   : > { %s1428_s27 = smov 64   ;;  %s1429_s28 = smov 4  }
  0x1f   : > { %1101 = dma.hbm_to_vmem [thread:$0]  (!%p1531_p6), %s315_s13, 1024, %s317_s25, [#allocation13], %s1428_s27, %s1428_s27, %s1429_s28  }
  0x20   : > { %s925_s22 = sadd.s32 4294967294, %s1420_s0   ;;  %s1546_s26 = sadd.s32 1, %s1420_s0  }
  0x21   : > { %1760 = sst [smem:[#allocation25_spill]] %s1546_s26  ;;  %s45_s11 = sadd.s32 1, %s1416_s19 }
  0x22   : > { %s42_s12 = ssub.s32 %s1420_s0, %s1546_s26  ;;  %p52_p7 = scmp.ne.s32.totalorder %s1416_s19, %s1412_s18 }
  0x23   : > { %p43_p8 = scmp.eq.s32.totalorder %s42_s12, 0  ;;  %p53_p9 = scmp.eq.s32.totalorder %s1420_s0, 0 }
  0x24   : > { %p58_p10 = scmp.ne.s32.totalorder %s1412_s18, %s1408_s17  ;;  %p255_p11 = scmp.eq.s32.totalorder %s1514_s23, 1 }
  0x25   : > { %s1558_s29 = scalar_select %p43_p8, %s1416_s19, %s45_s11  }
  0x26   : > { %p1560_p12 = por %p53_p9, %p52_p7  ;;  %p1566_p13 = por %p59_p1, %p58_p10 }
  0x27   : > { %1761 = sst [smem:[#allocation26_spill]] %s1558_s29  ;;  %p1570_p0 = por %p255_p11, %p52_p7 }
  0x28   : > { %p261_p2 = scmp.eq.s32.totalorder %s925_s22, 1  ;;  %p1116_p4 = scmp.lt.s32.totalorder %s1420_s0, 2 }
  0x29   : > { %s333_s15 = sand.u32 1, %s1416_s19   ;;  %s1048_s21 = sshll.u32 %s1420_s0, 3 }
  0x2a   : > { %p1576_p6 = por %p261_p2, %p58_p10  ;;  %s931_s20 = sshll.u32 %s333_s15, 1 }
  0x2b   : > { %s342_s28 = scalar_lea.hbm %s1733_s1, %s1048_s21  ;;  %s337_s12 = scalar_lea.vmem [#allocation6], %s931_s20 }
  0x2c   : > { %s1765_s16 = scalar_select %p1576_p6, 1, 0 }
  0x2d   : > { %s344_s11 = sshll.u32 %s342_s28, 4  ;;  %s346_s3 = sshll.u32 %s337_s12, 4  ;;  %s345_s11 = int_to_ptr.hbm [resolvable:$true] %s344_s11  ;;  %s347_s3 = int_to_ptr.vmem [resolvable:$true] %s346_s3 }
  0x2e   : > { %1766 = sst [smem:[#allocation27_spill]] %s1765_s16  ;;  %p1586_p7 = pnand %p1116_p4, %p1560_p12 }
  0x2f   : > { %s840_s29 = scalar_lea.hbm %s1734_s2, %s1048_s21  ;;  %s353_s19 = sand.u32 1, %s1420_s0  }
  0x30   : > { %s334_s26 = scalar_lea.sflag [#allocation7], %s333_s15  ;;  %s1280_s25 = sshra.s32 %s345_s11, 4  ;;  %s1281_s25 = int_to_ptr.hbm [resolvable:$true] %s1280_s25 }
  0x31   : > { %s1282_s27 = scalar_lea.hbm %s1281_s25, 2  ;;  %p1284_p9 = pneg %p1586_p7 }
  0x32   : > { %p1283_p8 = scmp.ne.s32.totalorder %s1281_s25, %s1282_s27  ;;  %s1287_s12 = scalar_lea.hbm %s1733_s1, 16 }
  0x33   : > { %p1288_p12 = scmp.lt.s32.totalorder %s1281_s25, %s1733_s1  ;;  %p1289_p2 = scmp.lt.s32.totalorder %s1287_s12, %s1282_s27 }
  0x34   : > { %p1285_p10 = pnand %p1284_p9, %p1283_p8 }
  0x35   : > { %p1290_p4 = por %p1289_p2, %p1288_p12 }
  0x36   : > { %p1286_p11 = pneg %p1285_p10 }
  0x38   : > { %p1291_p5 = pnand %p1290_p4, %p1286_p11 }
  0x3a   : > { %1294 = shalt.err (!%p1291_p5)
}
  0x3b   : > { %1105 = dma.hbm_to_vmem [thread:$0]  (!%p1586_p7), %s345_s11, 32, %s347_s3, %s334_s26  }
  0x3c   : > { %s841_s15 = scalar_lea.hbm %s840_s29, 4  ;;  %s357_s21 = scalar_lea.vmem [#allocation9], %s931_s20 }
  0x3d   : > { %s367_s0 = sshll.u32 %s357_s21, 4  ;;  %s365_s16 = sshll.u32 %s841_s15, 4  ;;  %s368_s0 = int_to_ptr.vmem [resolvable:$true] %s367_s0  ;;  %s366_s16 = int_to_ptr.hbm [resolvable:$true] %s365_s16 }
  0x3e   : > { %s354_s14 = scalar_lea.sflag [#allocation10], %s353_s19  ;;  %s1310_s28 = sshra.s32 %s366_s16, 4  ;;  %s1311_s28 = int_to_ptr.hbm [resolvable:$true] %s1310_s28 }
  0x3f   : > { %s1312_s17 = scalar_lea.hbm %s1311_s28, 2  ;;  %s1317_s12 = scalar_lea.hbm %s1734_s2, 16 }
  0x40   : > { %p1313_p8 = scmp.ne.s32.totalorder %s1311_s28, %s1312_s17  ;;  %p1318_p5 = scmp.lt.s32.totalorder %s1311_s28, %s1734_s2 }
  0x41   : > { %p1319_p12 = scmp.lt.s32.totalorder %s1317_s12, %s1312_s17 }
  0x42   : > { %p1315_p10 = pnand %p1313_p8, %p1284_p9 }
  0x43   : > { %p1320_p2 = por %p1319_p12, %p1318_p5 }
  0x44   : > { %p1316_p11 = pneg %p1315_p10 }
  0x46   : > { %p1321_p4 = pnand %p1320_p2, %p1316_p11 }
  0x48   : > { %1324 = shalt.err (!%p1321_p4)
}
  0x49   : > { %1108 = dma.hbm_to_vmem [thread:$0]  (!%p1586_p7), %s366_s16, 32, %s368_s0, %s354_s14  }
  0x4a   : > { %376 = sbr.rel (%p1519_p3) target bundleno = 462 (0x1ce), region = 56  ;;  %s1621_s19 = sand.u32 (!%p1519_p3), 1, %s1412_s18  }
  0x4b   : > { %s938_s29 = sshll.u32 (!%p1519_p3), %s1621_s19, 1  ;;  %s379_s20 = scalar_lea.sflag (!%p1519_p3), [#allocation7], %s1621_s19 }
  0x4c   : > { %s1625_s11 = scalar_lea.vmem (!%p1519_p3), [#allocation6], %s938_s29 }
  0x4f   : > { %1387 = dma.done.wait (%p1566_p13), %s379_s20, 32  }
  0x50   : > { %1389 = vsyncadd (%p1566_p13), %s379_s20, 4294967264  ;;  %s388_s17 = sand.u32 1, %s1514_s23   ;;  %s1632_s24 = scalar_lea.vmem [#allocation9], %s938_s29 }
  0x51   : > { %s389_s0 = scalar_lea.sflag [#allocation10], %s388_s17 }
  0x52   : > { %1391 = dma.done.wait (%p1566_p13), %s389_s0, 32  }
  0x53   : > { %1393 = vsyncadd (%p1566_p13), %s389_s0, 4294967264 }
  0x54   : > { %1395 = dma.done.wait (%p59_p1), [#allocation10], 2048  }
  0x55   : > { %1397 = vsyncadd (%p59_p1), [#allocation10], 4294965248 }
  0x56   : > { %1399 = dma.done.wait (%p59_p1), [#allocation13], 1152  }
  0x57   : > { %1401 = vsyncadd (%p59_p1), [#allocation13], 4294966144  ;;  %v451_v0 = vlaneseq  ;;  %v1064_v1 = vld [vmem:[#allocation11 + $0x74] sm:$0xf]  ;;  %v1008_v2 = vld [vmem:[#allocation11 + $0x78] sm:$0xf0] }
  0x58   : > { %v1062_v3 = vld [vmem:[#allocation11 + $0x64] sm:$0xf]  ;;  %v1011_v4 = vor.u32 %v1064_v1, %v1008_v2  ;;  %v1000_v5 = vld [vmem:[#allocation11 + $0x68] sm:$0xf0]  ;;  %v1006_v6 = vld [vmem:[#allocation11 + $0x70] sm:$0xf] }
  0x59   : > { %v452_v7 = vshrl.u32 %v451_v0, 7  ;;  %v1003_v8 = vor.u32 %v1062_v3, %v1000_v5  ;;  %v1060_v9 = vld [vmem:[#allocation11 + $0x54] sm:$0xf]  ;;  %v1065_v10 = vld [vmem:[#allocation11 + $0x74] sm:$0xf0]  ;;  %s1647_s30 = sld [smem:[#allocation5 + %s1514_s23]] }
  0x5a   : > { %599 = vmatpush.bf16.msra.mxu1 %v1011_v4  ;;  %625 = vmatpush.bf16.msra.mxu3 %v1011_v4  ;;  %v992_v11 = vld [vmem:[#allocation11 + $0x58] sm:$0xf0]  ;;  %v1007_v12 = vor.u32 %v1065_v10, %v1006_v6  ;;  %v998_v13 = vld [vmem:[#allocation11 + $0x60] sm:$0xf]  ;;  %v1063_v14 = vld [vmem:[#allocation11 + $0x64] sm:$0xf0] }
  0x5b   : > { %v999_v15 = vor.u32 %v1063_v14, %v998_v13  ;;  %v453_v16 = vmul.u32 4, %v452_v7  ;;  %v995_v17 = vor.u32 %v1060_v9, %v992_v11  ;;  %v990_v18 = vld [vmem:[#allocation11 + $0x50] sm:$0xf]  ;;  %v1061_v19 = vld [vmem:[#allocation11 + $0x54] sm:$0xf0]  ;;  %v1430_v37 = vmov 0  }
  0x5c   : > { %612 = vmatpush.bf16.msra.mxu2 %v1007_v12  ;;  %586 = vmatpush.bf16.msra.mxu0 %v1007_v12  ;;  %v1058_v20 = vld [vmem:[#allocation11 + $0x44] sm:$0xf]  ;;  %v984_v21 = vld [vmem:[#allocation11 + $0x48] sm:$0xf0]  ;;  %v1056_v22 = vld [vmem:[#allocation11 + $0x34] sm:$0xf]  ;;  %v991_v23 = vor.u32 %v1061_v19, %v990_v18  ;;  %v465_v47 = vunpack.c.l.b16 %v1430_v37  ;;  %v466_v48 = vunpack.c.h.b16 %v1430_v37 }
  0x5d   : > { %v456_v24 = vadd.s32 2, %v453_v16  ;;  %v987_v25 = vor.u32 %v1058_v20, %v984_v21  ;;  %v976_v26 = vld [vmem:[#allocation11 + $0x38] sm:$0xf0]  ;;  %v982_v27 = vld [vmem:[#allocation11 + $0x40] sm:$0xf]  ;;  %v1070_v20 = vld [vmem:[#allocation14 + $0x20] sm:$0xff] }
  0x5e   : > { %600 = vmatpush.bf16.msra.mxu1 %v1003_v8  ;;  %626 = vmatpush.bf16.msra.mxu3 %v1003_v8  ;;  %v1059_v28 = vld [vmem:[#allocation11 + $0x44] sm:$0xf0]  ;;  %v979_v32 = vor.u32 %v1056_v22, %v976_v26  ;;  %v974_v33 = vld [vmem:[#allocation11 + $0x30] sm:$0xf]  ;;  %v1057_v34 = vld [vmem:[#allocation11 + $0x34] sm:$0xf0] }
  0x5f   : > { %v454_v29 = vstv %s1647_s30  ;;  %v983_v30 = vor.u32 %v1059_v28, %v982_v27  ;;  %v1054_v35 = vld [vmem:[#allocation11 + $0x24] sm:$0xf]  ;;  %v968_v36 = vld [vmem:[#allocation11 + $0x28] sm:$0xf0]  ;;  %v975_v39 = vor.u32 %v1057_v34, %v974_v33  ;;  %v966_v42 = vld [vmem:[#allocation11 + $0x20] sm:$0xf] }
  0x60   : > { %613 = vmatpush.bf16.msra.mxu2 %v999_v15  ;;  %587 = vmatpush.bf16.msra.mxu0 %v999_v15  ;;  %vm1650_vm0 = vcmp.lt.s32.totalorder %v453_v16, %v454_v29  ;;  %vm457_vm1 = vcmp.lt.s32.totalorder %v456_v24, %v454_v29  ;;  %v971_v41 = vor.u32 %v1054_v35, %v968_v36  ;;  %v1055_v43 = vld [vmem:[#allocation11 + $0x24] sm:$0xf0]  ;;  %v1052_v44 = vld [vmem:[#allocation11 + $0x14] sm:$0xf]  ;;  %v960_v45 = vld [vmem:[#allocation11 + $0x18] sm:$0xf0] }
  0x61   : > { %v461_v38 = vsel %vm1650_vm0, 1, %v1430_v37  ;;  %v474_v40 = vsel %vm457_vm1, 1, %v1430_v37  ;;  %v967_v50 = vor.u32 %v1055_v43, %v966_v42  ;;  %v963_v51 = vor.u32 %v1052_v44, %v960_v45  ;;  %v958_v52 = vld [vmem:[#allocation11 + $0x10] sm:$0xf]  ;;  %v1053_v53 = vld [vmem:[#allocation11 + $0x14] sm:$0xf0] }
  0x62   : > { %601 = vmatpush.bf16.msra.mxu1 %v995_v17  ;;  %627 = vmatpush.bf16.msra.mxu3 %v995_v17  ;;  %v944_v46 = vunpack.i.l.s16 %v461_v38  ;;  %v946_v49 = vunpack.i.l.s16 %v474_v40  ;;  %v1050_v54 = vld [vmem:[#allocation11 + $0x4] sm:$0xf]  ;;  %v952_v55 = vld [vmem:[#allocation11 + $0x8] sm:$0xf0]  ;;  %v959_v60 = vor.u32 %v1053_v53, %v958_v52  ;;  %v458_v62 = vld [vmem:[%s1625_s11] sm:$0x3] }
  0x63   : > { %v955_v61 = vor.u32 %v1050_v54, %v952_v55  ;;  %v471_v63 = vld [vmem:[%s1632_s24] sm:$0x3]  ;;  %v950_v0 = vld [vmem:[#allocation11] sm:$0xf]  ;;  %v1051_v1 = vld [vmem:[#allocation11 + $0x4] sm:$0xf0] }
  0x64   : > { %614 = vmatpush.bf16.msra.mxu2 %v991_v23  ;;  %588 = vmatpush.bf16.msra.mxu0 %v991_v23  ;;  %vm1656_vm2 = vcmp.ne.s32.totalorder %v944_v46, %v465_v47  ;;  %vm1660_vm3 = vcmp.ne.s32.totalorder %v944_v46, %v466_v48  ;;  %vm1664_vm4 = vcmp.ne.s32.totalorder %v946_v49, %v465_v47  ;;  %v500_v5 = vld [vmem:[%s1736_s4] sm:$0x3]  ;;  %v1073_v7 = vld [vmem:[#allocation14 + $0x38] sm:$0xff]  ;;  %v1431_v8 = vmov 0.0   ;;  %v1072_v11 = vld [vmem:[#allocation14 + $0x30] sm:$0xff]  ;;  %s1045_s14 = sshll.u32 %s1514_s23, 2 }
  0x65   : > { %vm1668_vm5 = vcmp.ne.s32.totalorder %v946_v49, %v466_v48  ;;  %vm469_vm6 = vmpackc.low %vm1660_vm3, %vm1656_vm2  ;;  %v951_v4 = vor.u32 %v1051_v1, %v950_v0  ;;  %v503_v6 = vperm.slane %v500_v5, 1  ;;  %650 = vst [vmem:[#allocation2] sm:$0x3] %v1431_v8  ;;  %v1071_v15 = vld [vmem:[#allocation14 + $0x28] sm:$0xff]  ;;  %v502_v28 = vperm.slane %v500_v5, 0  ;;  %v1068_v29 = vld [vmem:[#allocation14 + $0x10] sm:$0xff]  ;;  %s797_s12 = scalar_lea.hbm %s1742_s10, %s1045_s14 }
  0x66   : > { %602 = vmatpush.bf16.msra.mxu1 %v987_v25  ;;  %628 = vmatpush.bf16.msra.mxu3 %v987_v25  ;;  %vm482_vm7 = vmpackc.low %vm1668_vm5, %vm1664_vm4  ;;  %v470_v2 = vsel %vm469_vm6, %v458_v62, 0  ;;  %651 = vst [vmem:[#allocation2 + $0x6] sm:$0x3] %v1431_v8  ;;  %v1069_v25 = vld [vmem:[#allocation14 + $0x18] sm:$0xff]  ;;  %v1067_v35 = vld [vmem:[#allocation14 + $0x8] sm:$0xff]  ;;  %s943_s28 = sshll.u32 %s1621_s19, 2 }
  0x67   : > { %v483_v3 = vsel %vm482_vm7, %v471_v63, 0  ;;  %652 = vst [vmem:[#allocation3] sm:$0x3] %v1431_v8  ;;  %v656_v42 = vld [vmem:[#allocation12] sm:$0x7f]  ;;  %s447_s29 = scalar_lea.vmem [#allocation15], %s943_s28 }
  0x68   : > { %615 = vmatpush.bf16.msra.mxu2 %v983_v30  ;;  %589 = vmatpush.bf16.msra.mxu0 %v983_v30  ;;  %653 = vst [vmem:[#allocation3 + $0x6] sm:$0x3] %v1431_v8  ;;  %v662_v43 = vperm.slane %v656_v42, 1  ;;  %v658_v45 = vperm.slane %v656_v42, 0  ;;  %v666_v47 = vperm.slane %v656_v42, 2  ;;  %v674_v55 = vperm.slane %v656_v42, 4 }
  0x69   : > { %v678_v59 = vperm.slane %v656_v42, 5  ;;  %v682_v63 = vperm.slane %v656_v42, 6  ;;  %v1163_v5 = vld [vmem:[%s1738_s6] ss:$0 sm:$0xff]  ;;  %s799_s20 = sshll.u32 %s447_s29, 4  ;;  %s801_s11 = sshll.u32 %s797_s12, 4  ;;  %s800_s20 = int_to_ptr.vmem [resolvable:$true] %s799_s20  ;;  %s802_s11 = int_to_ptr.hbm [resolvable:$true] %s801_s11 }
  0x6a   : > { %603 = vmatpush.bf16.msra.mxu1 %v979_v32  ;;  %629 = vmatpush.bf16.msra.mxu3 %v979_v32  ;;  %s787_s23 = scalar_lea.sflag [#allocation8], %s1621_s19  ;;  %s1354_s17 = sshra.s32 %s802_s11, 4  ;;  %s1355_s17 = int_to_ptr.hbm [resolvable:$true] %s1354_s17 }
  0x6b   : > { %s1356_s0 = scalar_lea.hbm %s1355_s17, 4  ;;  %s1360_s16 = scalar_lea.hbm %s1742_s10, 8 }
  0x6c   : > { %616 = vmatpush.bf16.msra.mxu2 %v975_v39  ;;  %590 = vmatpush.bf16.msra.mxu0 %v975_v39  ;;  %v1066_v39 = vld [vmem:[#allocation14] sm:$0xff]  ;;  %p1357_p1 = scmp.ne.s32.totalorder %s1355_s17, %s1356_s0  ;;  %p1361_p7 = scmp.lt.s32.totalorder %s1355_s17, %s1742_s10 }
  0x6d   : > { %p1362_p9 = scmp.lt.s32.totalorder %s1360_s16, %s1356_s0 }
  0x6e   : > { %604 = vmatpush.bf16.msra.mxu1 %v971_v41  ;;  %630 = vmatpush.bf16.msra.mxu3 %v971_v41  ;;  %p1358_p3 = pnand %p1357_p1, %p1570_p0 }
  0x6f   : > { %p1363_p8 = por %p1362_p9, %p1361_p7 }
  0x70   : > { %617 = vmatpush.bf16.msra.mxu2 %v967_v50  ;;  %591 = vmatpush.bf16.msra.mxu0 %v967_v50  ;;  %p1359_p13 = pneg %p1358_p3 }
  0x72   : > { %605 = vmatpush.bf16.msra.mxu1 %v963_v51  ;;  %631 = vmatpush.bf16.msra.mxu3 %v963_v51  ;;  %v670_v51 = vperm.slane %v656_v42, 3  ;;  %p1364_p10 = pnand %p1363_p8, %p1359_p13 }
  0x74   : > { %618 = vmatpush.bf16.msra.mxu2 %v959_v60  ;;  %592 = vmatpush.bf16.msra.mxu0 %v959_v60 }
  0x76   : > { %606 = vmatpush.bf16.msra.mxu1 %v955_v61  ;;  %632 = vmatpush.bf16.msra.mxu3 %v955_v61 }
  0x78   : > { %619 = vmatpush.bf16.msra.mxu2 %v951_v4  ;;  %593 = vmatpush.bf16.msra.mxu0 %v951_v4 }
  0x79   : > { %607 = vmatmul.bf16.vlgmr.msra.gmra.mxu1 %v470_v2  ;;  %633 = vmatmul.bf16.vlgmr.msra.gmra.mxu3 %v483_v3 }
  0x7b   : > { %620 = vmatmul.bf16.vlgmr.msra.gmra.mxu2 %v483_v3  ;;  %594 = vmatmul.bf16.vlgmr.msra.gmra.mxu0 %v470_v2 }
  0x7c   : > { %771 = vmatpush.bf16.msrb.mxu0 %v1073_v7  ;;  %v1164_v7 = vld [vmem:[%s1739_s7] ss:$0 sm:$0xff] }
  0x80   : > { %772 = vmatpush.bf16.msrb.mxu0 %v1072_v11 }
  0x84   : > { %773 = vmatpush.bf16.msrb.mxu0 %v1071_v15 }
  0x88   : > { %774 = vmatpush.bf16.msrb.mxu0 %v1070_v20 }
  0x8c   : > { %775 = vmatpush.bf16.msrb.mxu0 %v1069_v25 }
  0x90   : > { %776 = vmatpush.bf16.msrb.mxu0 %v1068_v29 }
  0x94   : > { %777 = vmatpush.bf16.msrb.mxu0 %v1067_v35 }
  0x98   : > { %778 = vmatpush.bf16.msrb.mxu0 %v1066_v39 }
  0xf6   : > { %v608_v9 = vpop.f32.mrf.mxu1 }
  0xf7   : > { %v609_v10 = vadd.f32 %v608_v9, %v503_v6 }
  0xf8   : > { %v595_v13 = vpop.f32.mrf.mxu0 }
  0xf9   : > { %v638_v12 = vsub.f32 0.0, %v609_v10  ;;  %v596_v33 = vadd.f32 %v595_v13, %v502_v28 }
  0xfb   : > { %v639_v14 = vmul.f32 1.442695, %v638_v12 }
  0xfc   : > { %v634_v16 = vpop.f32.mrf.mxu3 }
  0xfd   : > { %1166 = vpow2.f32 %v639_v14  ;;  %v635_v17 = vadd.f32 %v634_v16, %v503_v6 }
  0xfe   : > { %v610_v18 = vpop.f32.mrf.mxu1  ;;  %v621_v21 = vpop.f32.mrf.mxu2 }
  0xff   : > { %v644_v19 = vsub.f32 0.0, %v635_v17  ;;  %v622_v38 = vadd.f32 %v621_v21, %v502_v28  ;;  %v1165_v18 = vld [vmem:[%s1741_s9] ss:$0 sm:$0xff] }
 0x100   : > { %v597_v23 = vpop.f32.mrf.mxu0 }
 0x101   : > { %v645_v22 = vmul.f32 1.442695, %v644_v19 }
 0x103   : > { %v1167_v24 = vpop.eup %1166  ;;  %1168 = vpow2.f32 %v645_v22 }
 0x104   : > { %v641_v26 = vadd.f32 1.0, %v1167_v24  ;;  %v636_v27 = vpop.f32.mrf.mxu3 }
 0x106   : > { %1170 = vrcp.f32 %v641_v26  ;;  %v623_v30 = vpop.f32.mrf.mxu2 }
 0x109   : > { %v1169_v32 = vpop.eup %1168 }
 0x10a   : > { %v647_v34 = vadd.f32 1.0, %v1169_v32 }
 0x10c   : > { %v1171_v36 = vpop.eup %1170  ;;  %1172 = vrcp.f32 %v647_v34 }
 0x10d   : > { %v643_v37 = vmul.f32 %v1171_v36, %v596_v33 }
 0x10f   : > { %654 = vst [vmem:[#allocation2 + $0x2] sm:$0xf] %v643_v37 }
 0x112   : > { %v1173_v40 = vpop.eup %1172 }
 0x113   : > { %v649_v41 = vmul.f32 %v1173_v40, %v622_v38 }
 0x115   : > { %655 = vst [vmem:[#allocation3 + $0x2] sm:$0xf] %v649_v41 }
 0x116   : > { %v661_v44 = vld [vmem:[#allocation2 + $0x1] sm:$0xf] }
 0x117   : > { %v663_v46 = vmul.f32 %v662_v43, %v661_v44  ;;  %v669_v52 = vld [vmem:[#allocation2 + $0x2] sm:$0xf] }
 0x118   : > { %v671_v58 = vmul.f32 %v670_v51, %v669_v52  ;;  %v677_v60 = vld [vmem:[#allocation2 + $0x3] sm:$0xf] }
 0x119   : > { %v679_v2 = vmul.f32 %v678_v59, %v677_v60 }
 0x11c   : > { %v657_v48 = vld [vmem:[#allocation3] sm:$0xf] }
 0x11d   : > { %v665_v49 = vld [vmem:[#allocation3 + $0x1] sm:$0xf]  ;;  %v659_v50 = vmul.f32 %v658_v45, %v657_v48 }
 0x11e   : > { %v667_v54 = vmul.f32 %v666_v47, %v665_v49  ;;  %v673_v56 = vld [vmem:[#allocation3 + $0x2] sm:$0xf] }
 0x11f   : > { %v664_v53 = vadd.f32 %v663_v46, %v659_v50  ;;  %v675_v62 = vmul.f32 %v674_v55, %v673_v56  ;;  %v681_v0 = vld [vmem:[#allocation3 + $0x3] sm:$0xf] }
 0x120   : > { %v683_v4 = vmul.f32 %v682_v63, %v681_v0 }
 0x121   : > { %v668_v57 = vadd.f32 %v667_v54, %v664_v53 }
 0x123   : > { %v672_v61 = vadd.f32 %v671_v58, %v668_v57 }
 0x125   : > { %v676_v1 = vadd.f32 %v675_v62, %v672_v61 }
 0x127   : > { %v680_v3 = vadd.f32 %v679_v2, %v676_v1 }
 0x129   : > { %v684_v6 = vadd.f32 %v683_v4, %v680_v3 }
 0x12b   : > { %v689_v8 = vmul.f32 %v1163_v5, %v684_v6 }
 0x12d   : > { %v694_v9 = vadd.f32 %v1164_v7, %v689_v8 }
 0x12f   : > { %v695_v10 = vsel %vm1650_vm0, %v694_v9, %v684_v6 }
 0x130   : > { %v696_v11 = vsub.f32 0.0, %v695_v10 }
 0x132   : > { %v697_v12 = vmul.f32 1.442695, %v696_v11 }
 0x134   : > { %1174 = vpow2.f32 %v697_v12 }
 0x13a   : > { %v1175_v13 = vpop.eup %1174 }
 0x13b   : > { %v699_v14 = vadd.f32 1.0, %v1175_v13 }
 0x13d   : > { %1176 = vrcp.f32 %v699_v14 }
 0x143   : > { %v1177_v15 = vpop.eup %1176 }
 0x144   : > { %v701_v16 = vmul.f32 %v1177_v15, %v695_v10 }
 0x146   : > { %v702_v17 = vpack.c.bf16 %v701_v16, %v701_v16 }
 0x148   : > { %779 = vmatmul.bf16.vlgmr.msrb.gmra.mxu0 %v702_v17 }
 0x1c5   : > { %v780_v19 = vpop.f32.mrf.mxu0 }
 0x1c6   : > { %v781_v20 = vadd.f32 %v1165_v18, %v780_v19 }
 0x1c8   : > { %v784_v21 = vsel %vm1650_vm0, %v781_v20, 0.0 }
 0x1c9   : > { %785 = vst [vmem:[%s447_s29] sm:$0xf] %v784_v21 }
 0x1ca   : > { %1367 = shalt.err (!%p1364_p10)
}
 0x1cb   : > { %1090 = dma.vmem_to_hbm [thread:$0]  (%p1570_p0), %s800_s20, 64, %s802_s11, %s787_s23  }
 0x1cd   : > { %v782_v31 = vpop.f32.mrf.mxu0 }
 0x1ce PF: > { %s1778_s19 = sld [smem:[#allocation22_spill]] }
 0x1cf   : > { %s1780_s15 = sld [smem:[#allocation24_spill]] }
 0x1d4   : > { %s813_s21 = sand.u32 1, %s1778_s19  }
 0x1d5   : > { %p1781_p11 = scmp.ge.s32.totalorder %s1780_s15, 2  ;;  %s814_s14 = scalar_lea.sflag [#allocation8], %s813_s21 }
 0x1d7   : > { %p1110_p5 = pnand %p1781_p11, %p1576_p6 }
 0x1d9   : > { %p1111_p12 = pneg %p1110_p5 }
 0x1db   : > { %1403 = dma.done.wait (%p1111_p12), %s814_s14, 64  }
 0x1dc   : > { %1405 = vsyncadd (%p1111_p12), %s814_s14, 4294967232  ;;  %s1782_s0 = sld [smem:[#allocation25_spill]]  ;;  %s1785_s17 = smov %s1412_s18 }
 0x1dd   : > { %s1783_s28 = sld [smem:[#allocation23_spill]] }
 0x1de   : > { %s1784_s19 = sld [smem:[#allocation26_spill]] }
 0x1e2   : > { %p35_p2 = scmp.ge.s32.totalorder %s1782_s0, 4  }
 0x1e3   : > { %s1786_s18 = smov %s1783_s28 }
 0x1e4   :  { %37 = sbr.rel (!%p35_p2) target bundleno = 16 (0x10), region = 126 }
 0x1e9   :  { %820 = vsyncpa [#allocation7], 1 }
 0x1ea   :  { %822 = vsyncpa [#allocation7 + $0x1], 1 }
 0x1eb   :  { %823 = vsyncpa [#allocation10], 1 }
 0x1ec   :  { %825 = vsyncpa [#allocation10 + $0x1], 1 }
 0x1ed   :  { %826 = vsyncpa [#allocation13], 1 }
 0x1ee   :  { %827 = vsyncpa [#allocation8], 1 }
 0x1ef   :  { %829 = vsyncpa [#allocation8 + $0x1], 1 }

</bundles_post_ra>
